<compile_context>
chip_gen: v7x
topology: tpu7x:2x2x1
jax: 0.10.0
libtpu: 0.0.40
codegen_flags: <defaults>
</compile_context>

<pallas_src>
from typing import NamedTuple

import jax
import jax.numpy as jnp
from jax.experimental import pallas as pl
from jax.experimental.pallas import tpu as pltpu


def _round_up(x, m):
    return (x + m - 1) // m * m


def _cdiv(a, b):
    return (a + b - 1) // b


# -----------------------------------------------------------------------------
# Kernels
# -----------------------------------------------------------------------------
def _conv1d_kernel_single_k(x_ref, w_ref, b_ref, o_ref):
    # Single K tile: no accumulator scratch, no zero-init, no read-modify-write.
    o_ref[...] = (
        jnp.dot(x_ref[...], w_ref[...], preferred_element_type=jnp.float32)
        + b_ref[...]
    ).astype(o_ref.dtype)


def _conv1d_kernel_multi_k(x_ref, w_ref, b_ref, o_ref, acc_ref):
    k = pl.program_id(2)

    @pl.when(k == 0)
    def _():
        acc_ref[...] = jnp.zeros_like(acc_ref)

    acc_ref[...] += jnp.dot(
        x_ref[...], w_ref[...], preferred_element_type=jnp.float32)

    @pl.when(k == pl.num_programs(2) - 1)
    def _():
        o_ref[...] = (acc_ref[...] + b_ref[...]).astype(o_ref.dtype)


# -----------------------------------------------------------------------------
# Parameter preparation (done once at load time, not per forward call)
# -----------------------------------------------------------------------------
class Conv1DParams(NamedTuple):
    weight: jax.Array   # (nx, nf_pad), compute dtype, N-padded to the tile width
    bias2d: jax.Array   # (1, nf_pad), float32
    nx: int
    nf: int


def prepare_conv1d_params(weight, bias, compute_dtype=jnp.bfloat16):
    nx, nf = weight.shape
    if nf <= 512:
        nf_pad = _round_up(nf, 128)          # single lane-dense N tile
    else:
        nf_pad = _round_up(nf, 512)          # divisible by 512 and 256 tiles
    w = weight if compute_dtype is None else weight.astype(compute_dtype)
    b = bias
    if nf_pad != nf:
        w = jnp.pad(w, ((0, 0), (0, nf_pad - nf)))
        b = jnp.pad(b, ((0, nf_pad - nf),))
    b2d = b.reshape(1, nf_pad).astype(jnp.float32)
    return Conv1DParams(weight=w, bias2d=b2d, nx=nx, nf=nf)


# -----------------------------------------------------------------------------
# Forward
# -----------------------------------------------------------------------------
def conv1d_apply(x, params, *, vmem_block_budget=40 * 1024 * 1024):
    nx, nf = params.nx, params.nf
    orig_shape = x.shape
    assert orig_shape[-1] == nx
    out_dtype = x.dtype

    w = params.weight
    b2d = params.bias2d
    nf_pad = w.shape[1]

    x2d = x.reshape(-1, nx)
    m = x2d.shape[0]
    if x2d.dtype != w.dtype:
        x2d = x2d.astype(w.dtype)

    in_isz = jnp.dtype(w.dtype).itemsize
    out_isz = jnp.dtype(out_dtype).itemsize

    # ---- block footprint model (double-buffered inputs/outputs + f32 acc) ---
    def footprint(tm, tn, tk, multi):
        f = 2 * (tm * tk * in_isz + tk * tn * in_isz
                 + tm * tn * out_isz + tn * 4)
        if multi:
            f += tm * tn * 4
        return f

    # ---- M tiles: large multiples of 8, no activation padding (cdiv grid) ---
    tm_top = m if m < 8 else min(512, (m // 8) * 8)
    tm_cands = [tm_top]
    c = 256
    while c >= 8:
        if c < tm_top:
            tm_cands.append(c)
        c //= 2

    # ---- N tiles: prefer 512/256 (MXU-aligned on v6e/v7x); nf_pad divides ---
    if nf_pad <= 512:
        tn_cands = [nf_pad]
        for cc in (256, 128):
            if cc < nf_pad and nf_pad % cc == 0:
                tn_cands.append(cc)
    else:
        tn_cands = [cc for cc in (512, 256, 128) if nf_pad % cc == 0]

    # ---- choose tiles: single full-K tile whenever the slab fits VMEM -------
    sel = None
    for tn_c in tn_cands:
        for tm_c in tm_cands:
            if footprint(tm_c, tn_c, nx, multi=False) <= vmem_block_budget:
                sel = (tm_c, tn_c, nx, 1)
                break
        if sel is not None:
            break
    if sel is None:
        # Multi-K fallback (very large nx only). Keep tk >= 512 so the MXU,
        # not vld/vst or DMA, stays the binding unit.
        for tk_c in (4096, 2048, 1024, 512):
            for tn_c in tn_cands:
                for tm_c in tm_cands:
                    if footprint(tm_c, tn_c, tk_c, True) <= vmem_block_budget:
                        sel = (tm_c, tn_c, tk_c, _cdiv(nx, tk_c))
                        break
                if sel is not None:
                    break
            if sel is not None:
                break
    assert sel is not None, "no VMEM-feasible tiling found"
    tm_eff, tn_eff, tk_eff, k_tiles = sel
    k_pad = tk_eff * k_tiles

    # ---- megacore (v7x, 2 TCs): make sure there are >= 2 parallel tiles -----
    m_tiles = _cdiv(m, tm_eff)
    n_tiles = nf_pad // tn_eff
    if m_tiles * n_tiles < 2:
        if tn_eff >= 256:
            tn_eff //= 2
        elif tm_eff >= 16:
            tm_eff //= 2
        m_tiles = _cdiv(m, tm_eff)
        n_tiles = nf_pad // tn_eff

    # ---- K padding only in the (rare) multi-K regime; pad BOTH operands -----
    if k_pad != nx:
        x2d = jnp.pad(x2d, ((0, 0), (0, k_pad - nx)))
        w = jnp.pad(w, ((0, k_pad - nx), (0, 0)))
        # TODO(synk): fold this weight K-pad into prepare_conv1d_params so the
        # multi-K regime also pays the weight pad once, not per call.

    # ---- grid order: minimize redundant HBM operand passes -------------------
    x_bytes = m * k_pad * in_isz
    w_bytes = k_pad * nf_pad * in_isz
    if k_tiles == 1:
        # N-outer: weight slab read once, x read n_tiles times.
        # M-outer: x read once, weight read m_tiles times.
        n_outer = x_bytes * (n_tiles - 1) <= w_bytes * (m_tiles - 1)
    else:
        n_outer = True

    if n_outer:
        grid = (n_tiles, m_tiles, k_tiles)
        x_map = lambda j, i, k: (i, k)
        w_map = lambda j, i, k: (k, j)
        b_map = lambda j, i, k: (0, j)
        o_map = lambda j, i, k: (i, j)
    else:
        grid = (m_tiles, n_tiles, k_tiles)
        x_map = lambda i, j, k: (i, k)
        w_map = lambda i, j, k: (k, j)
        b_map = lambda i, j, k: (0, j)
        o_map = lambda i, j, k: (i, j)

    # ---- cost estimate with the actual redundant traffic --------------------
    if k_tiles == 1:
        x_passes = n_tiles if n_outer else 1
        w_passes = 1 if n_outer else m_tiles
    else:
        x_passes, w_passes = n_tiles, m_tiles
    cost = pl.CostEstimate(
        flops=2 * m * k_pad * nf_pad,
        transcendentals=0,
        bytes_accessed=(x_passes * x_bytes + w_passes * w_bytes
                        + m * nf_pad * out_isz + nf_pad * 4),
    )

    # ---- VMEM limit sized to the real block footprint (safe on 64 MiB v7x) --
    blk_bytes = footprint(tm_eff, tn_eff, tk_eff, k_tiles > 1)
    vmem_limit = int(min(max(blk_bytes + (8 << 20), 32 << 20), 48 << 20))

    if k_tiles == 1:
        kernel = _conv1d_kernel_single_k
        scratch = []
    else:
        kernel = _conv1d_kernel_multi_k
        scratch = [pltpu.VMEM((tm_eff, tn_eff), jnp.float32)]

    out = pl.pallas_call(
        kernel,
        out_shape=jax.ShapeDtypeStruct((m, nf_pad), out_dtype),
        grid_spec=pltpu.PrefetchScalarGridSpec(
            num_scalar_prefetch=0,
            grid=grid,
            in_specs=[
                pl.BlockSpec((tm_eff, tk_eff), x_map),
                pl.BlockSpec((tk_eff, tn_eff), w_map),
                pl.BlockSpec((1, tn_eff), b_map),
            ],
            out_specs=pl.BlockSpec((tm_eff, tn_eff), o_map),
            scratch_shapes=scratch,
        ),
        compiler_params=pltpu.CompilerParams(
            dimension_semantics=("parallel", "parallel", "arbitrary"),
            vmem_limit_bytes=vmem_limit),
        cost_estimate=cost,
    )(x2d, w, b2d)

    if nf_pad != nf:
        out = out[:, :nf]
    return out.reshape(*orig_shape[:-1], nf)


def conv1d(x, weight, bias, *, compute_dtype=jnp.bfloat16, **kwargs):
    """y = x @ weight + bias over the last axis of x (GPT Conv1D semantics).

    In a real model, call prepare_conv1d_params once at parameter-load time
    and reuse the result with conv1d_apply.
    """
    return conv1d_apply(
        x, prepare_conv1d_params(weight, bias, compute_dtype), **kwargs)


if __name__ == "__main__":
    # Module config (nf = output features, nx = input features).
    nx, nf = 32, 64
    batch, seq = 2, 8

    key = jax.random.PRNGKey(0)
    k_w, k_b, k_x = jax.random.split(key, 3)

    # Same shapes / init scheme as the PyTorch __init__ (weight ~ N(0, 0.02^2));
    # a nonzero bias is used to exercise the bias path.
    weight = (0.02 * jax.random.normal(k_w, (nx, nf))).astype(jnp.float32)
    bias = (0.02 * jax.random.normal(k_b, (nf,))).astype(jnp.float32)
    x = jax.random.normal(k_x, (batch, seq, nx), dtype=jnp.float32)

    ref = (x.reshape(-1, nx) @ weight + bias).reshape(batch, seq, nf)

    # Default bf16 compute path (f32 accumulate): bf16-level agreement.
    y = jax.block_until_ready(conv1d(x, weight, bias))
    assert y.shape == (batch, seq, nf)
    assert y.dtype == x.dtype
    assert jnp.allclose(y, ref, atol=2e-2, rtol=2e-2)

    # Exact f32 path: matches the PyTorch forward to float32 precision.
    y32 = jax.block_until_ready(conv1d(x, weight, bias, compute_dtype=None))
    assert jnp.allclose(y32, ref, atol=1e-5, rtol=1e-5)

    # Ragged / non-aligned shapes exercise the cdiv-M grid and N-padding paths.
    nx2, nf2 = 48, 96
    b2, s2 = 3, 5
    k_w2, k_x2 = jax.random.split(jax.random.PRNGKey(1))
    w2 = (0.02 * jax.random.normal(k_w2, (nx2, nf2))).astype(jnp.float32)
    bias2 = jnp.zeros((nf2,), jnp.float32)
    x2 = jax.random.normal(k_x2, (b2, s2, nx2), dtype=jnp.float32)
    ref2 = (x2.reshape(-1, nx2) @ w2 + bias2).reshape(b2, s2, nf2)
    y2 = jax.block_until_ready(conv1d(x2, w2, bias2, compute_dtype=None))
    assert jnp.allclose(y2, ref2, atol=1e-5, rtol=1e-5)

    print("KERNEL_OK")
</pallas_src>

<mosaic_0001>
module attributes {stable_mosaic.version = 11 : i64} {
  func.func @_conv1d_kernel_single_k(%arg0: i32, %arg1: i32, %arg2: i32, %arg3: memref<8x32xbf16, #tpu.memory_space<vmem>>, %arg4: memref<32x128xbf16, #tpu.memory_space<vmem>>, %arg5: memref<1x128xf32, #tpu.memory_space<vmem>>, %arg6: memref<8x128xf32, #tpu.memory_space<vmem>>) attributes {dimension_semantics = [#tpu.dimension_semantics<parallel>, #tpu.dimension_semantics<parallel>, #tpu.dimension_semantics<arbitrary>], iteration_bounds = array<i64: 1, 2, 1>, scalar_prefetch = 0 : i64, scratch_operands = 0 : i64, tpu.core_type = #tpu.core_type<tc>, window_params = [{transform_indices = @transform_0, window_bounds = array<i64: 8, 32>}, {transform_indices = @transform_1, window_bounds = array<i64: 32, 128>}, {transform_indices = @transform_2, window_bounds = array<i64: 1, 128>}, {transform_indices = @transform_3, window_bounds = array<i64: 8, 128>}]} {
    %c0 = arith.constant 0 : index
    %c0_0 = arith.constant 0 : index
    %0 = vector.load %arg3[%c0, %c0_0] : memref<8x32xbf16, #tpu.memory_space<vmem>>, vector<8x32xbf16>
    %c0_1 = arith.constant 0 : index
    %c0_2 = arith.constant 0 : index
    %1 = vector.load %arg4[%c0_1, %c0_2] : memref<32x128xbf16, #tpu.memory_space<vmem>>, vector<32x128xbf16>
    %cst = arith.constant dense<0.000000e+00> : vector<8x128xf32>
    %2 = tpu.matmul %0, %1, %cst {dimension_numbers = #tpu.dot_dimension_numbers<[1], [0], [0], [1], [0, 0, 1, 1], [], []>} : vector<8x32xbf16>, vector<32x128xbf16>, vector<8x128xf32> -> vector<8x128xf32>
    %c0_3 = arith.constant 0 : index
    %c0_4 = arith.constant 0 : index
    %3 = vector.load %arg5[%c0_3, %c0_4] : memref<1x128xf32, #tpu.memory_space<vmem>>, vector<1x128xf32>
    %4 = vector.broadcast %3 : vector<1x128xf32> to vector<8x128xf32>
    %5 = arith.addf %2, %4 : vector<8x128xf32>
    %c0_5 = arith.constant 0 : index
    %c0_6 = arith.constant 0 : index
    %6 = vector.load %arg6[%c0_5, %c0_6] : memref<8x128xf32, #tpu.memory_space<vmem>>, vector<8x128xf32>
    tpu.vector_store %arg6[%c0_5, %c0_6], %5 {strides = array<i32>} : memref<8x128xf32, #tpu.memory_space<vmem>>, vector<8x128xf32>,
    return
  }
  func.func @transform_0(%arg0: i32, %arg1: i32, %arg2: i32) -> (i32, i32) {
    %c0_i32 = arith.constant 0 : i32
    return %arg1, %arg2 : i32, i32
  }
  func.func @transform_1(%arg0: i32, %arg1: i32, %arg2: i32) -> (i32, i32) {
    %c0_i32 = arith.constant 0 : i32
    return %arg2, %arg0 : i32, i32
  }
  func.func @transform_2(%arg0: i32, %arg1: i32, %arg2: i32) -> (i32, i32) {
    %c0_i32 = arith.constant 0 : i32
    %c0_i32_0 = arith.constant 0 : i32
    return %c0_i32, %arg0 : i32, i32
  }
  func.func @transform_3(%arg0: i32, %arg1: i32, %arg2: i32) -> (i32, i32) {
    %c0_i32 = arith.constant 0 : i32
    return %arg1, %arg0 : i32, i32
  }
}

</mosaic_0001>

<bundles_post_ra>
// kernel: tpu_custom_call.1
= control target key start
LH: loop header
LB: loop body
LE: loop exit
PB: predicated region body
PF: predicated region fallthrough
CT: control target
= control target key end

     0   :  { %8 = vsyncpa [#allocation3], 0  ;;  %s946_s0 = inlined_call_operand.hbm [shape: bf16[16,32], index: 0, kind: input, shape index: {}]   ;;  %s947_s1 = inlined_call_operand.hbm [shape: bf16[32,128], index: 1, kind: input, shape index: {}]   ;;  %s948_s2 = inlined_call_operand.vmem [shape: f32[1,128], index: 2, kind: input, shape index: {}]   ;;  %s949_s3 = inlined_call_operand.hbm [shape: f32[16,128], index: 3, kind: output, shape index: {}]  }
   0x1   :  { %10 = vsyncpa [#allocation3 + $0x1], 0 }
   0x2   :  { %11 = vsyncpa [#allocation6], 0 }
   0x3   :  { %12 = vsyncpa [#allocation4], 0 }
   0x4   :  { %14 = vsyncpa [#allocation4 + $0x1], 0  ;;  %s728_s12 = smov 0   ;;  %s730_s13 = smov 0  }
   0x5   :  { %s732_s14 = smov 0   ;;  %s734_s15 = smov 0  }
   0x6   :  { %s736_s16 = smov 0   ;;  %s738_s17 = smov 0  }
   0x7 LB: > { %s445_s18 = sadd.s32 4294967295, %s699_s17   ;;  %s446_s19 = sadd.s32 4294967294, %s699_s17   ;;  %s699_s17 = sphi %s738_s17, %s20_s17   ;;  %s695_s16 = sphi %s736_s16, %s973_s16   ;;  %s691_s15 = sphi %s734_s15, %s972_s15   ;;  %s687_s14 = sphi %s732_s14, %s971_s14   ;;  %s683_s13 = sphi %s730_s13, %s970_s13   ;;  %s679_s12 = sphi %s728_s12, %s969_s12  }
   0x8   : > { %p61_p0 = scmp.ne.s32.totalorder %s683_s13, %s679_s12  ;;  %p762_p1 = scmp.eq.s32.totalorder %s445_s18, 0 }
   0x9   : > { %p766_p2 = scmp.eq.s32.totalorder %s445_s18, 1  ;;  %p147_p3 = scmp.eq.s32.totalorder %s446_s19, 1 }
   0xa   : > { %s954_s20 = scalar_select %p762_p1, 1, 0 }
   0xb   : > { %s955_s21 = scalar_select %p766_p2, 1, 0 }
   0xc   : > { %p772_p4 = por %p762_p1, %p61_p0  ;;  %p447_p5 = scmp.ge.s32.totalorder %s699_s17, 1 }
   0xd   : > { %p777_p6 = por %p147_p3, %p61_p0  ;;  %p154_p7 = scmp.lt.s32.totalorder %s699_s17, 3 }
   0xe   : > { %s956_s22 = scalar_select %p772_p4, 1, 0 }
   0xf   : > { %s957_s23 = scalar_select %p777_p6, 1, 0 }
  0x10   : > { %p782_p8 = pnand %p447_p5, %p154_p7  ;;  %s701_s25 = smov [#allocation5]  }
  0x11   : > { %s170_s26 = sshll.u32 %s701_s25, 4  ;;  %s35_s28 = sadd.s32 1, %s695_s16  ;;  %s171_s26 = int_to_ptr.vmem [resolvable:$true] %s170_s26 }
  0x12   : > { %s958_s24 = scalar_select %p782_p8, 1, 0 }
  0x13   : > { %p484_p9 = pneg %p782_p8  ;;  %s555_s4 = scalar_lea.hbm %s947_s1, 256 }
  0x14   : > { %p556_p12 = scmp.ne.s32.totalorder %s947_s1, %s555_s4  ;;  %p562_p5 = scmp.lt.u32.totalorder %s555_s4, %s947_s1 }
  0x15   : > { %p791_p11 = pnand %p484_p9, %p762_p1 }
  0x17   : > { %p557_p13 = pneg %p791_p11 }
  0x19   : > { %p558_p0 = pnand %p557_p13, %p556_p12 }
  0x1b   : > { %p559_p3 = pneg %p558_p0 }
  0x1d   : > { %p564_p7 = pnand %p562_p5, %p559_p3 }
  0x1f   : > { %567 = shalt.err (!%p564_p7)
}
  0x20   : > { %s568_s9 = scalar_lea.vmem %s171_s26, 256  ;;  %p576_p1 = scmp.lt.s32.totalorder %s171_s26, %s171_s26 }
  0x21   : > { %p569_p9 = scmp.ne.s32.totalorder %s171_s26, %s568_s9  ;;  %p577_p4 = scmp.lt.s32.totalorder %s568_s9, %s568_s9 }
  0x23   : > { %p571_p10 = pnand %p569_p9, %p557_p13  ;;  %p578_p8 = por %p577_p4, %p576_p1 }
  0x25   : > { %p572_p6 = pneg %p571_p10 }
  0x27   : > { %p579_p2 = pnand %p578_p8, %p572_p6 }
  0x29   : > { %582 = shalt.err (!%p579_p2)
}
  0x2a   : > { %s702_s10 = smov 64   ;;  %s703_s11 = smov 4  }
  0x2b   : > { %487 = dma.hbm_to_vmem [thread:$0]  (!%p791_p11), %s947_s1, 256, %s171_s26, [#allocation6], %s702_s10, %s702_s10, %s703_s11  }
  0x2c   : > { %p37_p1 = scmp.ge.s32.totalorder %s35_s28, 2  ;;  %s48_s25 = sadd.s32 1, %s687_s14 }
  0x2d   : > { %p55_p2 = scmp.ne.s32.totalorder %s687_s14, %s683_s13  ;;  %p56_p4 = scmp.eq.s32.totalorder %s699_s17, 0 }
  0x2e   : > { %s975_s28 = smov (%p37_p1, %s35_s28), 0  ;;  %p961_p8 = scmp.ne.s32.totalorder %s955_s21, 0 }
  0x2f   : > { %p818_p6 = por %p56_p4, %p55_p2  ;;  %s43_s27 = ssub.s32 %s695_s16, %s975_s28 }
  0x30   : > { %p824_p10 = por %p961_p8, %p55_p2  ;;  %p497_p12 = scmp.lt.s32.totalorder %s699_s17, 2 }
  0x31   : > { %p46_p11 = scmp.eq.s32.totalorder %s43_s27, 0  ;;  %s190_s26 = sand.u32 1, %s687_s14  }
  0x32   : > { %s451_s4 = sshll.u32 %s190_s26, 2  ;;  %s452_s6 = sshll.u32 %s695_s16, 6 }
  0x33   : > { %s833_s5 = scalar_select %p46_p11, %s687_s14, %s48_s25  }
  0x34   : > { %s839_s9 = scalar_lea.hbm %s946_s0, %s452_s6  ;;  %s194_s21 = scalar_lea.vmem [#allocation2], %s451_s4 }
  0x35   : > { %s202_s10 = sshll.u32 %s194_s21, 4  ;;  %p845_p13 = pnand %p497_p12, %p818_p6  ;;  %s841_s10 = int_to_ptr.vmem [resolvable:$true] %s202_s10 }
  0x36   : > { %s191_s18 = scalar_lea.sflag [#allocation3], %s190_s26  ;;  %s583_s19 = scalar_lea.hbm %s839_s9, 64 }
  0x37   : > { %p584_p0 = scmp.ne.s32.totalorder %s839_s9, %s583_s19  ;;  %p585_p3 = pneg %p845_p13 }
  0x38   : > { %s588_s4 = scalar_lea.hbm %s946_s0, 128  ;;  %p589_p9 = scmp.lt.u32.totalorder %s839_s9, %s946_s0 }
  0x39   : > { %p586_p5 = pnand %p585_p3, %p584_p0  ;;  %p590_p1 = scmp.lt.u32.totalorder %s588_s4, %s583_s19 }
  0x3a   : > { %p592_p4 = scmp.lt.u32.totalorder %s583_s19, %s839_s9 }
  0x3b   : > { %p587_p7 = pneg %p586_p5  ;;  %p591_p2 = por %p590_p1, %p589_p9 }
  0x3d   : > { %p593_p6 = por %p592_p4, %p591_p2 }
  0x3f   : > { %p594_p8 = pnand %p593_p6, %p587_p7 }
  0x41   : > { %597 = shalt.err (!%p594_p8)
}
  0x42   : > { %s598_s26 = scalar_lea.vmem %s841_s10, 64  ;;  %s704_s7 = smov [#allocation2]  }
  0x43   : > { %p599_p12 = scmp.ne.s32.totalorder %s841_s10, %s598_s26  ;;  %s603_s8 = sshll.u32 %s704_s7, 4  ;;  %s604_s8 = int_to_ptr.vmem [resolvable:$false] %s603_s8 }
  0x44   : > { %s605_s21 = scalar_lea.vmem %s604_s8, 128  ;;  %p606_p5 = scmp.lt.s32.totalorder %s841_s10, %s604_s8 }
  0x45   : > { %p601_p11 = pnand %p599_p12, %p585_p3  ;;  %p607_p9 = scmp.lt.s32.totalorder %s605_s21, %s598_s26 }
  0x47   : > { %p602_p0 = pneg %p601_p11  ;;  %p608_p1 = por %p607_p9, %p606_p5 }
  0x49   : > { %p609_p2 = pnand %p608_p1, %p602_p0 }
  0x4b   : > { %612 = shalt.err (!%p609_p2)
}
  0x4c   : > { %491 = dma.hbm_to_vmem [thread:$0]  (!%p845_p13), %s839_s9, 64, %s841_s10, %s191_s18  }
  0x4d   : > { %p964_p7 = scmp.ne.s32.totalorder %s958_s24, 0 }
  0x4e   : > { %s877_s19 = sand.u32 (!%p964_p7), 1, %s683_s13   ;;  %p965_p3 = scmp.ne.s32.totalorder (!%p964_p7), %s956_s22, 0 }
  0x4f   : > { %211 = sbr.rel (%p964_p7) target bundleno = 327 (0x147), region = 32  ;;  %s454_s25 = sshll.u32 (!%p964_p7), %s877_s19, 2 }
  0x50   : > { %s214_s27 = scalar_lea.sflag (!%p964_p7), [#allocation3], %s877_s19  ;;  %s217_s4 = scalar_lea.vmem (!%p964_p7), [#allocation2], %s454_s25 }
  0x56   : > { %666 = dma.done.wait (%p965_p3), %s214_s27, 64  }
  0x57   : > { %668 = vsyncadd (%p965_p3), %s214_s27, 4294967232  ;;  %p966_p4 = scmp.ne.s32.totalorder %s954_s20, 0 }
  0x59   : > { %670 = dma.done.wait (%p966_p4), [#allocation6], 256  }
  0x5a   : > { %672 = vsyncadd (%p966_p4), [#allocation6], 4294967040  ;;  %v705_v0 = vmov 0.0   ;;  %vm706_vm0 = vmmov 0   ;;  %v553_v1 = vld [vmem:[#allocation5] sm:$0xff]   ;;  %v554_v2 = vld [vmem:[#allocation5 + $0x8] sm:$0xff]  }
  0x5b   : > { %468 = vmatprep.subr.bf16.mxu0 %v705_v0  ;;  %472 = vmatprep.mubr.msk.bf16.mxu0 %vm706_vm0, %v705_v0  ;;  %v252_v3 = vld [vmem:[%s217_s4] sm:$0xf]  ;;  %vm276_vm1 = vcmask 261120   ;;  %s456_s22 = sshll.u32 %s877_s19, 3  ;;  %s462_s20 = sshll.u32 %s691_s15, 7 }
  0x5c   : > { %469 = vmatpush3.bf16.msra.mxu0 %v553_v1  ;;  %v457_v4 = vld [vmem:[%s948_s2] ss:$0 sm:$0xff]  ;;  %s246_s10 = scalar_lea.vmem [#allocation7], %s456_s22  ;;  %s897_s6 = scalar_lea.hbm %s949_s3, %s462_s20 }
  0x5d   : > { %470 = vmatprep.subr.bf16.mxu0 %v705_v0  ;;  %s336_s11 = sshll.u32 %s246_s10, 4  ;;  %s322_s26 = scalar_lea.sflag [#allocation4], %s877_s19  ;;  %s899_s11 = int_to_ptr.vmem [resolvable:$true] %s336_s11 }
  0x5e   : > { %s613_s15 = scalar_lea.vmem %s899_s11, 128  ;;  %s707_s7 = smov [#allocation7]  }
  0x5f   : > { %p614_p13 = scmp.ne.s32.totalorder %s899_s11, %s613_s15  ;;  %s617_s8 = sshll.u32 %s707_s7, 4  ;;  %s618_s8 = int_to_ptr.vmem [resolvable:$false] %s617_s8 }
  0x60   : > { %471 = vmatpush3.bf16.msra.mxu0 %v554_v2  ;;  %s619_s21 = scalar_lea.vmem %s618_s8, 256  ;;  %p620_p12 = scmp.lt.s32.totalorder %s899_s11, %s618_s8 }
  0x61   : > { %p615_p6 = pnand %p614_p13, %p824_p10  ;;  %p621_p11 = scmp.lt.s32.totalorder %s619_s21, %s613_s15 }
  0x63   : > { %473 = vmatmul.mubr.msk.bf16.vlgmr.msra.gmra.mrb[0].mxu0 %vm276_vm1, %v252_v3  ;;  %p616_p8 = pneg %p615_p6  ;;  %p622_p0 = por %p621_p11, %p620_p12 }
  0x65   : > { %p623_p5 = pnand %p622_p0, %p616_p8 }
 0x136   : > { %v314_v5 = vpop.f32.mrb[0].mxu0 }
 0x137   : > { %v315_v6 = vadd.f32 %v457_v4, %v314_v5  ;;  %v474_v7 = vpop.f32.mrb[1].mxu0 }
 0x138   : > { %v317_v8 = vpop.f32.mrb[2].mxu0 }
 0x139   : > { %320 = vst [vmem:[%s246_s10] sm:$0xff] %v315_v6  ;;  %v475_v9 = vpop.f32.mrb[3].mxu0 }
 0x13a   : > { %626 = shalt.err (!%p623_p5)
}
 0x13b   : > { %s627_s19 = scalar_lea.hbm %s897_s6, 128  ;;  %s631_s4 = scalar_lea.hbm %s949_s3, 256 }
 0x13c   : > { %p628_p9 = scmp.ne.s32.totalorder %s897_s6, %s627_s19  ;;  %p632_p7 = scmp.lt.u32.totalorder %s897_s6, %s949_s3 }
 0x13d   : > { %p633_p3 = scmp.lt.u32.totalorder %s631_s4, %s627_s19  ;;  %p635_p13 = scmp.lt.u32.totalorder %s627_s19, %s897_s6 }
 0x13e   : > { %p629_p1 = pnand %p628_p9, %p824_p10 }
 0x13f   : > { %p634_p4 = por %p633_p3, %p632_p7 }
 0x140   : > { %p630_p2 = pneg %p629_p1 }
 0x141   : > { %p636_p6 = por %p635_p13, %p634_p4 }
 0x143   : > { %p637_p8 = pnand %p636_p6, %p630_p2 }
 0x145   : > { %640 = shalt.err (!%p637_p8)
}
 0x146   : > { %482 = dma.vmem_to_hbm [thread:$0]  (%p824_p10), %s899_s11, 128, %s897_s6, %s322_s26  }
 0x147 PF: > { %s348_s9 = sand.u32 1, %s679_s12   ;;  %p967_p12 = scmp.ne.s32.totalorder %s957_s23, 0 }
 0x148   : > { %p968_p11 = scmp.ge.s32.totalorder %s699_s17, 2  ;;  %s349_s20 = scalar_lea.sflag [#allocation4], %s348_s9 }
 0x14a   : > { %p493_p0 = pnand %p968_p11, %p967_p12 }
 0x14c   : > { %674 = dma.done.wait (!%p493_p0), %s349_s20, 128  }
 0x14d   : > { %676 = vsyncadd (!%p493_p0), %s349_s20, 4294967168  ;;  %s20_s17 = sadd.s32 1, %s699_s17   ;;  %s969_s12 = smov %s683_s13 }
 0x14e   : > { %p17_p5 = scmp.ge.s32.totalorder %s20_s17, 4   ;;  %s970_s13 = smov %s687_s14 }
 0x14f   : > { %s971_s14 = smov %s833_s5  ;;  %s972_s15 = smov %s695_s16 }
 0x150   : > { %s973_s16 = smov %s975_s28  ;;  %19 = sbr.rel (!%p17_p5) target bundleno = 7 (0x7), region = 85 }
 0x157   :  { %354 = vsyncpa [#allocation3], 1 }
 0x158   :  { %356 = vsyncpa [#allocation3 + $0x1], 1 }
 0x159   :  { %357 = vsyncpa [#allocation6], 1 }
 0x15a   :  { %358 = vsyncpa [#allocation4], 1 }
 0x15b   :  { %360 = vsyncpa [#allocation4 + $0x1], 1 }

</bundles_post_ra>
